<compile_context>
chip_gen: v7x
topology: tpu7x:2x2x1
jax: 0.10.0
libtpu: 0.0.40
codegen_flags: <defaults>
</compile_context>

<pallas_src>
import jax
import jax.numpy as jnp
import numpy as np
from jax import lax
from jax.experimental import pallas as pl
from jax.experimental.pallas import tpu as pltpu

_LANES = 128
_BLOCK_ROWS = 1024  # 1024 x 128 x f32 = 512 KiB per buffer (x4 live with in+out double-buffering)


def _make_clip_kernel(height: int, width: int):
    max_x = float(width - 1)
    max_y = float(height - 1)

    def clip_kernel(x_ref, o_ref):
        x = x_ref[...]  # (block_rows, 128), lane-dense
        # Per-lane column id: [x1, y1, x2, y2] repeats every 4 lanes and the
        # pattern is row-invariant because 128 % 4 == 0. (1, 128) only; the
        # selects below are constant-foldable and broadcast over sublanes.
        col = lax.broadcasted_iota(jnp.int32, (1, _LANES), 1) & 3
        lo = jnp.where(col < 2, jnp.float32(0.0), jnp.float32(-jnp.inf))
        hi = jnp.where(
            col == 2,
            jnp.float32(max_x),
            jnp.where(col == 3, jnp.float32(max_y), jnp.float32(jnp.inf)),
        )
        o_ref[...] = jnp.minimum(jnp.maximum(x, lo.astype(x.dtype)),
                                 hi.astype(x.dtype))

    return clip_kernel


def clip_boxes(boxes: jax.Array, img: jax.Array) -> jax.Array:
    """Pallas equivalent of ClipBoxes.forward(boxes, img)."""
    _, _, height, width = img.shape
    B, N, four = boxes.shape
    assert four == 4, "boxes last dim must be 4"
    assert jnp.issubdtype(boxes.dtype, jnp.floating), "boxes must be floating point"

    total = B * N * 4
    rows = pl.cdiv(total, _LANES)

    if rows <= _BLOCK_ROWS:
        # Single block equal to the (padded) full array — allowed even if
        # rows is not a multiple of 8.
        block_rows = rows
        grid_rows = 1
    else:
        block_rows = _BLOCK_ROWS
        grid_rows = pl.cdiv(rows, _BLOCK_ROWS)
        rows = grid_rows * _BLOCK_ROWS

    padded_total = rows * _LANES
    flat = boxes.reshape(-1)
    if padded_total != total:
        flat = jnp.pad(flat, (0, padded_total - total))
    x2d = flat.reshape(rows, _LANES)

    out2d = pl.pallas_call(
        _make_clip_kernel(height, width),
        out_shape=jax.ShapeDtypeStruct((rows, _LANES), boxes.dtype),
        grid=(grid_rows,),
        in_specs=[pl.BlockSpec((block_rows, _LANES), lambda i: (i, 0))],
        out_specs=pl.BlockSpec((block_rows, _LANES), lambda i: (i, 0)),
        input_output_aliases={0: 0},
        compiler_params=pltpu.CompilerParams(
            dimension_semantics=("parallel",)),
    )(x2d)

    out_flat = out2d.reshape(-1)
    if padded_total != total:
        out_flat = out_flat[:total]
    return out_flat.reshape(B, N, 4)


def clip_boxes_ref(boxes, img):
    """Pure-JAX reference matching the PyTorch forward."""
    _, _, height, width = img.shape
    x1 = jnp.maximum(boxes[:, :, 0], 0.0)
    y1 = jnp.maximum(boxes[:, :, 1], 0.0)
    x2 = jnp.minimum(boxes[:, :, 2], float(width - 1))
    y2 = jnp.minimum(boxes[:, :, 3], float(height - 1))
    return jnp.stack([x1, y1, x2, y2], axis=-1)


if __name__ == "__main__":
    key = jax.random.PRNGKey(0)

    # Small shape consistent with the module (and a larger one to exercise the
    # padded / multi-block path).
    shapes = [
        (2, 8, 4, 16, 16),      # B, N, C, H, W  -> single (1, 128) block
        (2, 40000, 4, 64, 48),  # rows > _BLOCK_ROWS -> tiled grid + padding
    ]

    ok = True
    for B, N, C, H, W in shapes:
        key, kb, ki = jax.random.split(key, 3)
        boxes = jax.random.uniform(kb, (B, N, 4), dtype=jnp.float32,
                                   minval=-8.0, maxval=float(max(H, W)) + 8.0)
        img = jax.random.normal(ki, (B, C, H, W), dtype=jnp.float32)

        out = jax.block_until_ready(clip_boxes(boxes, img))
        ref = clip_boxes_ref(boxes, img)

        ok = ok and (out.shape == (B, N, 4))
        ok = ok and bool(jnp.array_equal(out, ref))

    assert ok, "mismatch vs reference"
    print("KERNEL_OK")
</pallas_src>

<mosaic_0001>
module attributes {stable_mosaic.version = 11 : i64} {
  func.func @clip_kernel(%arg0: i32, %arg1: memref<1x128xf32, #tpu.memory_space<vmem>>, %arg2: memref<1x128xf32, #tpu.memory_space<vmem>>) attributes {dimension_semantics = [#tpu.dimension_semantics<parallel>], iteration_bounds = array<i64: 1>, scalar_prefetch = 0 : i64, scratch_operands = 0 : i64, tpu.core_type = #tpu.core_type<tc>, window_params = [{transform_indices = @transform_0, window_bounds = array<i64: 1, 128>}, {transform_indices = @transform_1, window_bounds = array<i64: 1, 128>}]} {
    %c0 = arith.constant 0 : index
    %c0_0 = arith.constant 0 : index
    %0 = vector.load %arg1[%c0, %c0_0] : memref<1x128xf32, #tpu.memory_space<vmem>>, vector<1x128xf32>
    %1 = tpu.iota {dimensions = array<i32: 1>} : vector<1x128xi32>
    %c3_i32 = arith.constant 3 : i32
    %2 = vector.broadcast %c3_i32 : i32 to vector<1x128xi32>
    %3 = arith.andi %1, %2 : vector<1x128xi32>
    %c2_i32 = arith.constant 2 : i32
    %4 = vector.broadcast %c2_i32 : i32 to vector<1x128xi32>
    %5 = arith.cmpi slt, %3, %4 : vector<1x128xi32>
    %cst = arith.constant 0.000000e+00 : f32
    %cst_1 = arith.constant 0xFF800000 : f32
    %6 = vector.broadcast %cst : f32 to vector<1x128xf32>
    %7 = vector.broadcast %cst_1 : f32 to vector<1x128xf32>
    %8 = arith.select %5, %6, %7 : vector<1x128xi1>, vector<1x128xf32>
    %c2_i32_2 = arith.constant 2 : i32
    %9 = vector.broadcast %c2_i32_2 : i32 to vector<1x128xi32>
    %10 = arith.cmpi eq, %3, %9 : vector<1x128xi32>
    %c3_i32_3 = arith.constant 3 : i32
    %11 = vector.broadcast %c3_i32_3 : i32 to vector<1x128xi32>
    %12 = arith.cmpi eq, %3, %11 : vector<1x128xi32>
    %cst_4 = arith.constant 1.500000e+01 : f32
    %cst_5 = arith.constant 0x7F800000 : f32
    %13 = vector.broadcast %cst_4 : f32 to vector<1x128xf32>
    %14 = vector.broadcast %cst_5 : f32 to vector<1x128xf32>
    %15 = arith.select %12, %13, %14 : vector<1x128xi1>, vector<1x128xf32>
    %cst_6 = arith.constant 1.500000e+01 : f32
    %16 = vector.broadcast %cst_6 : f32 to vector<1x128xf32>
    %17 = arith.select %10, %16, %15 : vector<1x128xi1>, vector<1x128xf32>
    %18 = arith.maximumf %0, %8 : vector<1x128xf32>
    %19 = arith.minimumf %18, %17 : vector<1x128xf32>
    %c0_7 = arith.constant 0 : index
    %c0_8 = arith.constant 0 : index
    %20 = vector.load %arg2[%c0_7, %c0_8] : memref<1x128xf32, #tpu.memory_space<vmem>>, vector<1x128xf32>
    tpu.vector_store %arg2[%c0_7, %c0_8], %19 {strides = array<i32>} : memref<1x128xf32, #tpu.memory_space<vmem>>, vector<1x128xf32>,
    return
  }
  func.func @transform_0(%arg0: i32) -> (i32, i32) {
    %c0_i32 = arith.constant 0 : i32
    %c0_i32_0 = arith.constant 0 : i32
    return %arg0, %c0_i32 : i32, i32
  }
  func.func @transform_1(%arg0: i32) -> (i32, i32) {
    %c0_i32 = arith.constant 0 : i32
    %c0_i32_0 = arith.constant 0 : i32
    return %arg0, %c0_i32 : i32, i32
  }
}

</mosaic_0001>

<bundles_post_ra>
// kernel: tpu_custom_call.1
= control target key start
LH: loop header
LB: loop body
LE: loop exit
PB: predicated region body
PF: predicated region fallthrough
CT: control target
= control target key end

     0   :  { %6 = vsyncpa [#allocation3], 0  ;;  %s139_s0 = inlined_call_operand.hbm [shape: f32[1,128], index: 0, kind: input, shape index: {}, may-alias: {0,1}]   ;;  %s140_s1 = inlined_call_operand.hbm [shape: f32[1,128], index: 1, kind: output, shape index: {}, may-alias: {0,1}]  }
   0x1   :  { %7 = vsyncpa [#allocation4], 0  ;;  %s101_s6 = smov [#allocation2]   ;;  %s53_s10 = scalar_lea.hbm %s139_s0, 16 }
   0x2   :  { %s14_s7 = sshll.u32 %s101_s6, 4  ;;  %p54_p0 = scmp.ne.s32.totalorder %s139_s0, %s53_s10  ;;  %s15_s7 = int_to_ptr.vmem [resolvable:$true] %s14_s7 }
   0x3   :  { %p57_p1 = scmp.lt.u32.totalorder %s53_s10, %s139_s0 }
   0x5   :  { %p59_p2 = pnand %p57_p1, %p54_p0 }
   0x7   :  { %62 = shalt.err (!%p59_p2)
}
   0x8   :  { %s63_s15 = scalar_lea.vmem %s15_s7, 16  ;;  %s67_s16 = scalar_lea.vmem %s15_s7, 32 }
   0x9   :  { %p64_p3 = scmp.ne.s32.totalorder %s15_s7, %s63_s15  ;;  %p68_p4 = scmp.lt.s32.totalorder %s15_s7, %s15_s7 }
   0xa   :  { %p69_p5 = scmp.lt.s32.totalorder %s67_s16, %s63_s15 }
   0xc   :  { %p70_p6 = por %p69_p5, %p68_p4 }
   0xe   :  { %p71_p7 = pnand %p70_p6, %p64_p3 }
  0x10   :  { %74 = shalt.err (!%p71_p7)
}
  0x11   :  { %17 = dma.hbm_to_vmem [thread:$0]  %s139_s0, 16, %s15_s7, [#allocation3]  }
  0x12   :  { %97 = dma.done.wait [#allocation3], 16  }
  0x13   :  { %98 = vsyncadd [#allocation3], 4294967280  ;;  %v22_v0 = vlaneseq  ;;  %v21_v3 = vld [vmem:[#allocation2] sm:$0x1]  ;;  %v102_v4 = vmov -inf   ;;  %v103_v6 = vmov inf  }
  0x14   :  { %s104_s19 = smov [#allocation5]  }
  0x15   :  { %v23_v1 = vand.u32 127, %v22_v0  ;;  %s40_s20 = sshll.u32 %s104_s19, 4  ;;  %s41_s20 = int_to_ptr.vmem [resolvable:$true] %s40_s20 }
  0x16   :  { %s75_s0 = scalar_lea.vmem %s41_s20, 16  ;;  %s79_s21 = scalar_lea.vmem %s41_s20, 32 }
  0x17   :  { %v24_v2 = vand.u32 3, %v23_v1  ;;  %p76_p8 = scmp.ne.s32.totalorder %s41_s20, %s75_s0  ;;  %p80_p9 = scmp.lt.s32.totalorder %s41_s20, %s41_s20 }
  0x18   :  { %p81_p10 = scmp.lt.s32.totalorder %s79_s21, %s75_s0 }
  0x19   :  { %vm25_vm0 = vcmp.lt.s32.totalorder %v24_v2, 2  ;;  %vm27_vm1 = vcmp.eq.s32.totalorder %v24_v2, 2  ;;  %vm28_vm2 = vcmp.eq.s32.totalorder %v24_v2, 3 }
  0x1a   :  { %v26_v5 = vsel %vm25_vm0, 0.0, %v102_v4  ;;  %v29_v7 = vsel %vm28_vm2, 15.0, %v103_v6  ;;  %p82_p11 = por %p81_p10, %p80_p9 }
  0x1b   :  { %v30_v8 = vsel %vm27_vm1, 15.0, %v29_v7  ;;  %v31_v9 = vmax.f32 %v21_v3, %v26_v5 }
  0x1c   :  { %p83_p12 = pnand %p82_p11, %p76_p8 }
  0x1d   :  { %v32_v10 = vmin.f32 %v31_v9, %v30_v8 }
  0x1f   :  { %33 = vst [vmem:[#allocation5] sm:$0x1] %v32_v10 }
  0x20   :  { %86 = shalt.err (!%p83_p12)
}
  0x21   :  { %s87_s24 = scalar_lea.hbm %s140_s1, 16 }
  0x22   :  { %p88_p13 = scmp.ne.s32.totalorder %s140_s1, %s87_s24  ;;  %p91_p0 = scmp.lt.u32.totalorder %s87_s24, %s140_s1 }
  0x24   :  { %p93_p1 = pnand %p91_p0, %p88_p13 }
  0x26   :  { %96 = shalt.err (!%p93_p1)
}
  0x27   :  { %43 = dma.vmem_to_hbm [thread:$0]  %s41_s20, 16, %s140_s1, [#allocation4]  }
  0x28   :  { %99 = dma.done.wait [#allocation4], 16  }
  0x29   :  { %100 = vsyncadd [#allocation4], 4294967280 }
  0x2a   :  { %47 = vsyncpa [#allocation3], 1 }
  0x2b   :  { %48 = vsyncpa [#allocation4], 1 }

</bundles_post_ra>
